<compile_context>
chip_gen: v7x
topology: tpu7x:2x2x1
jax: 0.10.0
libtpu: 0.0.40
codegen_flags: <defaults>
</compile_context>

<pallas_src>
import functools

import jax
import jax.numpy as jnp
from jax.experimental import pallas as pl
from jax.experimental.pallas import tpu as pltpu


# --------------------------------- kernel ------------------------------------
def _sigmoid_flow_kernel(x_ref, y_ref, logdet_ref, *, mode, batch_tile, total_rows):
    """One (bt, dt) tile: writes y tile, accumulates logdet column over D blocks."""
    j = pl.program_id(1)                         # feature-block axis (reduction)
    x = x_ref[...]                               # (bt, dt) f32

    if total_rows is not None:
        # Ragged last batch block: replace garbage rows with a safe value so
        # the math stays finite.  Those rows are never written back to HBM
        # (Pallas drops out-of-range stores), and the reduction is per-row,
        # so valid rows are unaffected.
        row = (jax.lax.broadcasted_iota(jnp.int32, x.shape, 0)
               + pl.program_id(0) * batch_tile)
        fill = 0.5 if mode == "inverse" else 0.0
        x = jnp.where(row < total_rows, x, fill)

    if mode == "direct":
        # sigmoid via tanh: single EUP transcendental, no divide, no overflow.
        s = 0.5 * (jnp.tanh(0.5 * x) + 1.0)
        y_ref[...] = s
        # log(s*(1-s)) == -(|x| + 2*softplus(-|x|)), stable for large |x|.
        ax = jnp.abs(x)
        elem = -(ax + 2.0 * jnp.log1p(jnp.exp(-ax)))
    else:
        lx = jnp.log(x)
        l1mx = jnp.log1p(-x)
        y_ref[...] = lx - l1mx                   # log(x / (1 - x))
        elem = -(lx + l1mx)                      # -log(x - x^2)

    partial = jnp.sum(elem, axis=-1, keepdims=True)   # (bt, 1)

    @pl.when(j == 0)
    def _():
        logdet_ref[...] = jnp.zeros_like(logdet_ref)

    logdet_ref[...] += partial


# --------------------------------- wrapper -----------------------------------
def _round_up(n, m):
    return ((n + m - 1) // m) * m


def sigmoid_flow(x, mode="direct", *, batch_tile=1024, feature_tile=512):
    """Pallas implementation of the Sigmoid flow forward.

    x: (B, D) float32.  Returns (y, logdet) with shapes (B, D) and (B, 1).
    """
    x = x.astype(jnp.float32)
    B, D = x.shape

    # Batch tile: multiple of 8, as large as useful, but keep >= 2 grid steps
    # when possible so v7x's two TensorCores both get work.  No HBM padding;
    # the ragged last block is masked in-kernel.
    bt = min(batch_tile, _round_up(B, 8))
    if pl.cdiv(B, bt) < 2 and B > 8:
        bt = _round_up(pl.cdiv(B, 2), 8)
    nb = pl.cdiv(B, bt)

    # Feature tile: must be a multiple of 128 (lane-dense y stores) and divide
    # D exactly (so the per-row reduction never sees garbage columns); fall
    # back to full D when D isn't a multiple of 128.
    if D % 128 == 0:
        dt = min(_round_up(feature_tile, 128), D)
        while D % dt != 0:
            dt -= 128
    else:
        dt = D
    nd = D // dt

    kernel = functools.partial(
        _sigmoid_flow_kernel,
        mode=mode,
        batch_tile=bt,
        total_rows=B if (B % bt) else None,
    )

    y, logdet = pl.pallas_call(
        kernel,
        out_shape=(
            jax.ShapeDtypeStruct((B, D), jnp.float32),
            jax.ShapeDtypeStruct((B, 1), jnp.float32),
        ),
        grid_spec=pltpu.PrefetchScalarGridSpec(
            num_scalar_prefetch=0,
            grid=(nb, nd),
            in_specs=[
                pl.BlockSpec((bt, dt), lambda i, j: (i, j)),   # x tile
            ],
            out_specs=[
                pl.BlockSpec((bt, dt), lambda i, j: (i, j)),   # y (lane-dense)
                pl.BlockSpec((bt, 1), lambda i, j: (i, 0)),    # logdet (resident over j)
            ],
        ),
        compiler_params=pltpu.CompilerParams(
            dimension_semantics=("parallel", "arbitrary"),
        ),
    )(x)

    return y, logdet


# ------------------------------ pure-JAX reference ---------------------------
def sigmoid_flow_reference(x, mode="direct"):
    if mode == "direct":
        s = jax.nn.sigmoid(x)
        return s, jnp.sum(jnp.log(s * (1.0 - s)), axis=-1, keepdims=True)
    return (jnp.log(x / (1.0 - x)),
            -jnp.sum(jnp.log(x - x * x), axis=-1, keepdims=True))


# ----------------------------------- main ------------------------------------
if __name__ == "__main__":
    key = jax.random.PRNGKey(0)
    k_dir, k_inv = jax.random.split(key)

    B = 200          # deliberately NOT a multiple of the batch tile (ragged path)
    D = 128          # lane-dense feature width

    # --- direct mode (the module's forward default) ---
    x = jax.random.normal(k_dir, (B, D), jnp.float32)
    y, logdet = sigmoid_flow(x, mode="direct")
    jax.block_until_ready((y, logdet))

    y_ref, ld_ref = sigmoid_flow_reference(x, mode="direct")
    assert y.shape == (B, D) and logdet.shape == (B, 1)
    assert jnp.allclose(y, y_ref, atol=1e-5, rtol=1e-5)
    assert jnp.allclose(logdet, ld_ref, atol=1e-3, rtol=1e-5)

    # --- inverse mode ---
    x_inv = jax.random.uniform(k_inv, (B, D), jnp.float32, minval=0.05, maxval=0.95)
    yi, ldi = sigmoid_flow(x_inv, mode="inverse")
    jax.block_until_ready((yi, ldi))

    yi_ref, ldi_ref = sigmoid_flow_reference(x_inv, mode="inverse")
    assert jnp.allclose(yi, yi_ref, atol=1e-4, rtol=1e-4)
    assert jnp.allclose(ldi, ldi_ref, atol=1e-3, rtol=1e-4)

    print("KERNEL_OK")
</pallas_src>

<mosaic_0001>
module attributes {stable_mosaic.version = 11 : i64} {
  func.func @_sigmoid_flow_kernel(%arg0: i32, %arg1: i32, %arg2: memref<104x128xf32, #tpu.memory_space<vmem>>, %arg3: memref<104x128xf32, #tpu.memory_space<vmem>>, %arg4: memref<104x1xf32, #tpu.memory_space<vmem>>) attributes {dimension_semantics = [#tpu.dimension_semantics<parallel>, #tpu.dimension_semantics<arbitrary>], iteration_bounds = array<i64: 2, 1>, scalar_prefetch = 0 : i64, scratch_operands = 0 : i64, tpu.core_type = #tpu.core_type<tc>, window_params = [{transform_indices = @transform_0, window_bounds = array<i64: 104, 128>}, {transform_indices = @transform_1, window_bounds = array<i64: 104, 128>}, {transform_indices = @transform_2, window_bounds = array<i64: 104, 1>}]} {
    %c0 = arith.constant 0 : index
    %c0_0 = arith.constant 0 : index
    %0 = vector.load %arg2[%c0, %c0_0] : memref<104x128xf32, #tpu.memory_space<vmem>>, vector<104x128xf32>
    %1 = tpu.iota {dimensions = array<i32: 0>} : vector<104x128xi32>
    %c104_i32 = arith.constant 104 : i32
    %2 = arith.muli %arg0, %c104_i32 : i32
    %3 = vector.broadcast %2 : i32 to vector<104x128xi32>
    %4 = arith.addi %1, %3 : vector<104x128xi32>
    %c200_i32 = arith.constant 200 : i32
    %5 = vector.broadcast %c200_i32 : i32 to vector<104x128xi32>
    %6 = arith.cmpi slt, %4, %5 : vector<104x128xi32>
    %cst = arith.constant 0.000000e+00 : f32
    %7 = vector.broadcast %cst : f32 to vector<104x128xf32>
    %8 = arith.select %6, %0, %7 : vector<104x128xi1>, vector<104x128xf32>
    %cst_1 = arith.constant 5.000000e-01 : f32
    %9 = vector.broadcast %cst_1 : f32 to vector<104x128xf32>
    %10 = arith.mulf %9, %8 : vector<104x128xf32>
    %11 = math.tanh %10 : vector<104x128xf32>
    %cst_2 = arith.constant 1.000000e+00 : f32
    %12 = vector.broadcast %cst_2 : f32 to vector<104x128xf32>
    %13 = arith.addf %11, %12 : vector<104x128xf32>
    %cst_3 = arith.constant 5.000000e-01 : f32
    %14 = vector.broadcast %cst_3 : f32 to vector<104x128xf32>
    %15 = arith.mulf %14, %13 : vector<104x128xf32>
    %c0_4 = arith.constant 0 : index
    %c0_5 = arith.constant 0 : index
    %16 = vector.load %arg3[%c0_4, %c0_5] : memref<104x128xf32, #tpu.memory_space<vmem>>, vector<104x128xf32>
    tpu.vector_store %arg3[%c0_4, %c0_5], %15 {strides = array<i32>} : memref<104x128xf32, #tpu.memory_space<vmem>>, vector<104x128xf32>,
    %17 = math.absf %8 : vector<104x128xf32>
    %cst_6 = arith.constant 0.000000e+00 : f32
    %18 = vector.broadcast %cst_6 : f32 to vector<104x128xf32>
    %19 = arith.subf %18, %17 : vector<104x128xf32>
    %20 = math.exp %19 : vector<104x128xf32>
    %21 = math.log1p %20 : vector<104x128xf32>
    %cst_7 = arith.constant 2.000000e+00 : f32
    %22 = vector.broadcast %cst_7 : f32 to vector<104x128xf32>
    %23 = arith.mulf %22, %21 : vector<104x128xf32>
    %24 = arith.addf %17, %23 : vector<104x128xf32>
    %cst_8 = arith.constant 0.000000e+00 : f32
    %25 = vector.broadcast %cst_8 : f32 to vector<104x128xf32>
    %26 = arith.subf %25, %24 : vector<104x128xf32>
    %cst_9 = arith.constant dense<0.000000e+00> : vector<104xf32>
    %27 = vector.multi_reduction <add>, %26, %cst_9 [1] : vector<104x128xf32> to vector<104xf32>
    %28 = vector.shape_cast %27 : vector<104xf32> to vector<104x1xf32>
    %c0_i32 = arith.constant 0 : i32
    %29 = arith.cmpi eq, %arg1, %c0_i32 : i32
    %30 = arith.extui %29 : i1 to i32
    %c0_i32_10 = arith.constant 0 : i32
    %31 = arith.cmpi ne, %30, %c0_i32_10 : i32
    scf.if %31 {
      %cst_15 = arith.constant 0.000000e+00 : f32
      %35 = vector.broadcast %cst_15 : f32 to vector<104x1xf32>
      %c0_16 = arith.constant 0 : index
      %c0_17 = arith.constant 0 : index
      %36 = vector.load %arg4[%c0_16, %c0_17] : memref<104x1xf32, #tpu.memory_space<vmem>>, vector<104x1xf32>
      tpu.vector_store %arg4[%c0_16, %c0_17], %35 {strides = array<i32>} : memref<104x1xf32, #tpu.memory_space<vmem>>, vector<104x1xf32>,
    } else {
    }
    %c0_11 = arith.constant 0 : index
    %c0_12 = arith.constant 0 : index
    %32 = vector.load %arg4[%c0_11, %c0_12] : memref<104x1xf32, #tpu.memory_space<vmem>>, vector<104x1xf32>
    %33 = arith.addf %32, %28 : vector<104x1xf32>
    %c0_13 = arith.constant 0 : index
    %c0_14 = arith.constant 0 : index
    %34 = vector.load %arg4[%c0_13, %c0_14] : memref<104x1xf32, #tpu.memory_space<vmem>>, vector<104x1xf32>
    tpu.vector_store %arg4[%c0_13, %c0_14], %33 {strides = array<i32>} : memref<104x1xf32, #tpu.memory_space<vmem>>, vector<104x1xf32>,
    return
  }
  func.func @transform_0(%arg0: i32, %arg1: i32) -> (i32, i32) {
    %c0_i32 = arith.constant 0 : i32
    return %arg0, %arg1 : i32, i32
  }
  func.func @transform_1(%arg0: i32, %arg1: i32) -> (i32, i32) {
    %c0_i32 = arith.constant 0 : i32
    return %arg0, %arg1 : i32, i32
  }
  func.func @transform_2(%arg0: i32, %arg1: i32) -> (i32, i32) {
    %c0_i32 = arith.constant 0 : i32
    %c0_i32_0 = arith.constant 0 : i32
    return %arg0, %c0_i32 : i32, i32
  }
}

</mosaic_0001>

<bundles_post_ra>
// kernel: tpu_custom_call.1
= control target key start
LH: loop header
LB: loop body
LE: loop exit
PB: predicated region body
PF: predicated region fallthrough
CT: control target
= control target key end

     0   :  { %8 = vsyncpa [#allocation3], 0  ;;  %s1974_s0 = inlined_call_operand.hbm [shape: f32[200,128], index: 0, kind: input, shape index: {}]   ;;  %s1975_s1 = inlined_call_operand.hbm [shape: f32[200,128], index: 1, kind: output, shape index: {0}]   ;;  %s1976_s2 = inlined_call_operand.vmem [shape: f32[200,1], index: 2, kind: output, shape index: {1}]  }
   0x1   :  { %10 = vsyncpa [#allocation3 + $0x1], 0 }
   0x2   :  { %11 = vsyncpa [#allocation4], 0 }
   0x3   :  { %13 = vsyncpa [#allocation4 + $0x1], 0  ;;  %s1417_s9 = smov 0   ;;  %s1419_s10 = smov 0  }
   0x4   :  { %s1421_s11 = smov 0   ;;  %s1423_s12 = smov 0  }
   0x5   :  { %s1425_s13 = smov 0   ;;  %s1427_s14 = smov 0  }
   0x6 LB: > { %s980_s15 = sadd.s32 4294967295, %s1361_s14   ;;  %s981_s16 = sadd.s32 4294967294, %s1361_s14   ;;  %s1361_s14 = sphi %s1427_s14, %s19_s14   ;;  %s1357_s13 = sphi %s1425_s13, %s2006_s13   ;;  %s1353_s12 = sphi %s1423_s12, %s2005_s12   ;;  %s1349_s11 = sphi %s1421_s11, %s2004_s11   ;;  %s1345_s10 = sphi %s1419_s10, %s2003_s10   ;;  %s1341_s9 = sphi %s1417_s9, %s2002_s9  }
   0x7   : > { %s31_s17 = sadd.s32 1, %s1357_s13  ;;  %s40_s18 = sadd.s32 1, %s1349_s11 }
   0x8   : > { %p33_p0 = scmp.ge.s32.totalorder %s31_s17, 2  ;;  %p47_p1 = scmp.ne.s32.totalorder %s1349_s11, %s1345_s10 }
   0x9   : > { %p48_p2 = scmp.eq.s32.totalorder %s1361_s14, 0  ;;  %p53_p3 = scmp.ne.s32.totalorder %s1345_s10, %s1341_s9 }
   0xa   : > { %s2008_s17 = smov (%p33_p0, %s31_s17), 0  ;;  %p54_p5 = scmp.eq.s32.totalorder %s980_s15, 0 }
   0xb   : > { %p49_p4 = por %p48_p2, %p47_p1  ;;  %s35_s19 = ssub.s32 %s1357_s13, %s2008_s17 }
   0xc   : > { %p79_p6 = scmp.eq.s32.totalorder %s980_s15, 1  ;;  %p38_p7 = scmp.eq.s32.totalorder %s35_s19, 0 }
   0xd   : > { %p1460_p8 = por %p54_p5, %p53_p3  ;;  %p85_p10 = scmp.eq.s32.totalorder %s981_s16, 1 }
   0xe   : > { %p1464_p9 = por %p79_p6, %p47_p1  ;;  %p1977_p12 = scmp.ge.s32.totalorder %s1361_s14, 2 }
   0xf   : > { %s1469_s22 = scalar_select %p38_p7, %s1349_s11, %s40_s18  }
  0x10   : > { %p1471_p11 = por %p85_p10, %p53_p3  ;;  %127 = sbr.rel (%p1977_p12) target bundleno = 58 (0x3a), region = 16 }
  0x12   : > { %s1980_s23 = scalar_select %p1471_p11, 1, 0 }
  0x17   : > { %130 = sbr.rel (!%p49_p4) target bundleno = 58 (0x3a), region = 20  ;;  %s131_s24 = sand.u32 (%p49_p4), 1, %s1349_s11  }
  0x18   : > { %s136_s25 = smul.u32 (%p49_p4), 13, %s1357_s13  ;;  %s1483_s30 = scalar_lea.sflag (%p49_p4), [#allocation3], %s131_s24 }
  0x19   : > { %s1010_s26 = smul.u32 (%p49_p4), 104, %s131_s24 }
  0x1a   : > { %s137_s27 = ssub.s32 (%p49_p4), 25, %s136_s25 }
  0x1b   : > { %p138_p13 = scmp.lt.s32.totalorder (%p49_p4), %s137_s27, 13  ;;  %s135_s3 = scalar_lea.vmem (%p49_p4), [#allocation2], %s1010_s26 }
  0x1e   : > { %s2010_s27 = smov (!%p138_p13, %s137_s27), 13 }
  0x1f   : > { %s1480_s28 = sshll.u32 %s2010_s27, 7 }
  0x20   : > { %s142_s29 = ssub.s32 1664, %s1480_s28 }
  0x21   : > { %143 = vsyncadd %s1483_s30, %s142_s29  ;;  %p985_p0 = scmp.ne.s32.totalorder %s1480_s28, 0  ;;  %s1007_s4 = smul.u32 1664, %s1357_s13 }
  0x22   : > { %s149_s5 = sshll.u32 %s135_s3, 4  ;;  %s1223_s19 = scalar_lea.hbm %s1974_s0, 3200  ;;  %s1493_s5 = int_to_ptr.vmem [resolvable:$true] %s149_s5 }
  0x23   : > { %s1491_s8 = scalar_lea.hbm %s1974_s0, %s1007_s4 }
  0x24   : > { %s1219_s15 = scalar_lea.hbm %s1491_s8, %s1480_s28  ;;  %p1224_p4 = scmp.lt.u32.totalorder %s1491_s8, %s1974_s0 }
  0x25   : > { %p1220_p1 = scmp.ne.s32.totalorder %s1491_s8, %s1219_s15  ;;  %p1225_p5 = scmp.lt.u32.totalorder %s1223_s19, %s1219_s15 }
  0x26   : > { %p1227_p7 = scmp.lt.u32.totalorder %s1219_s15, %s1491_s8 }
  0x27   : > { %p1221_p2 = pnand %p1220_p1, %p985_p0  ;;  %p1226_p6 = por %p1225_p5, %p1224_p4 }
  0x29   : > { %p1222_p3 = pneg %p1221_p2  ;;  %p1228_p10 = por %p1227_p7, %p1226_p6 }
  0x2b   : > { %p1229_p13 = pnand %p1228_p10, %p1222_p3 }
  0x2d   : > { %1232 = shalt.err (!%p1229_p13)
}
  0x2e   : > { %s1233_s26 = scalar_lea.vmem %s1493_s5, %s1480_s28  ;;  %s1395_s27 = smov [#allocation2]  }
  0x2f   : > { %p1234_p1 = scmp.ne.s32.totalorder %s1493_s5, %s1233_s26  ;;  %s1237_s29 = sshll.u32 %s1395_s27, 4  ;;  %s1238_s29 = int_to_ptr.vmem [resolvable:$false] %s1237_s29 }
  0x30   : > { %s1239_s3 = scalar_lea.vmem %s1238_s29, 3328  ;;  %p1240_p11 = scmp.lt.s32.totalorder %s1493_s5, %s1238_s29 }
  0x31   : > { %p1235_p2 = pnand %p1234_p1, %p985_p0  ;;  %p1241_p4 = scmp.lt.s32.totalorder %s1239_s3, %s1233_s26 }
  0x33   : > { %p1236_p12 = pneg %p1235_p2  ;;  %p1242_p5 = por %p1241_p4, %p1240_p11 }
  0x35   : > { %p1243_p6 = pnand %p1242_p5, %p1236_p12 }
  0x37   : > { %1246 = shalt.err (!%p1243_p6)
}
  0x38   : > { %s1396_s4 = smov 128   ;;  %s1397_s6 = smov 8  }
  0x39   : > { %155 = dma.hbm_to_vmem [thread:$0]  (%p985_p0), %s1491_s8, %s1480_s28, %s1493_s5, %s1483_s30, %s1396_s4, %s1396_s4, %s1397_s6  }
  0x3a PF: > { %p989_p3 = scmp.ge.s32.totalorder %s1361_s14, 1  ;;  %p157_p7 = scmp.lt.s32.totalorder %s1361_s14, 3 }
  0x3c   : > { %p158_p10 = pnand %p989_p3, %p157_p7 }
  0x3d   : > { %s1523_s7 = sand.u32 (!%p158_p10), 1, %s1345_s10  }
  0x3e   : > { %161 = sbr.rel (%p158_p10) target bundleno = 413 (0x19d), region = 24  ;;  %s164_s16 = scalar_lea.sflag (!%p158_p10), [#allocation3], %s1523_s7 }
  0x3f   : > { %s1526_s15 = smul.u32 (!%p158_p10), 104, %s1523_s7 }
  0x41   : > { %s1530_s18 = scalar_lea.vmem (!%p158_p10), [#allocation2], %s1526_s15 }
  0x45   : > { %1332 = dma.done.wait (%p1460_p8), %s164_s16, 1664  }
  0x46   : > { %1334 = vsyncadd (%p1460_p8), %s164_s16, 4294965632  ;;  %v220_v0 = vlaneseq  ;;  %s234_s28 = smul.u32 104, %s1353_s12  ;;  %vm578_vm0 = vcmask 7168   ;;  %s1544_s30 = scalar_lea.vmem [#allocation6], %s1526_s15   ;;  %v1398_v3 = vmov 0.0   ;;  %v207_v15 = vld [vmem:[%s1530_s18] sm:$0xff] }
  0x47   : > { %579 = vst.msk [vmem:[%s1544_s30] sm:$0xff] %vm578_vm0, %v1398_v3  ;;  %580 = vst.msk [vmem:[%s1544_s30 + $0x8] sm:$0xff] %vm578_vm0, %v1398_v3  ;;  %v209_v16 = vld [vmem:[%s1530_s18 + $0x10] sm:$0xff]  ;;  %v208_v17 = vld [vmem:[%s1530_s18 + $0x8] sm:$0xff]  ;;  %s1649_s20 = scalar_lea.vmem [#allocation5], %s1526_s15  ;;  %s633_s5 = scalar_lea.sflag [#allocation4], %s1523_s7 }
  0x48   : > { %v1537_v1 = vshrl.u32 %v220_v0, 7  ;;  %v1541_v2 = vstv %s234_s28  ;;  %581 = vst.msk [vmem:[%s1544_s30 + $0x10] sm:$0xff] %vm578_vm0, %v1398_v3  ;;  %582 = vst.msk [vmem:[%s1544_s30 + $0x18] sm:$0xff] %vm578_vm0, %v1398_v3  ;;  %v210_v23 = vld [vmem:[%s1530_s18 + $0x18] sm:$0xff]  ;;  %s644_s8 = smul.u32 (%p1464_p9), 13, %s1353_s12 }
  0x49   : > { %583 = vst.msk [vmem:[%s1544_s30 + $0x20] sm:$0xff] %vm578_vm0, %v1398_v3  ;;  %584 = vst.msk [vmem:[%s1544_s30 + $0x28] sm:$0xff] %vm578_vm0, %v1398_v3  ;;  %v211_v28 = vld [vmem:[%s1530_s18 + $0x20] sm:$0xff]  ;;  %v212_v41 = vld [vmem:[%s1530_s18 + $0x28] sm:$0xff] }
  0x4a   : > { %585 = vst.msk [vmem:[%s1544_s30 + $0x30] sm:$0xff] %vm578_vm0, %v1398_v3  ;;  %586 = vst.msk [vmem:[%s1544_s30 + $0x38] sm:$0xff] %vm578_vm0, %v1398_v3  ;;  %v236_v4 = vadd.s32 %v1541_v2, %v1537_v1  ;;  %v223_v5 = vadd.s32 16, %v1537_v1  ;;  %v222_v6 = vadd.s32 8, %v1537_v1  ;;  %v224_v7 = vadd.s32 24, %v1537_v1  ;;  %v213_v47 = vld [vmem:[%s1530_s18 + $0x30] sm:$0xff] }
  0x4b   : > { %587 = vst.msk [vmem:[%s1544_s30 + $0x40] sm:$0xff] %vm578_vm0, %v1398_v3  ;;  %588 = vst.msk [vmem:[%s1544_s30 + $0x48] sm:$0xff] %vm578_vm0, %v1398_v3  ;;  %v225_v8 = vadd.s32 32, %v1537_v1  ;;  %v226_v9 = vadd.s32 40, %v1537_v1  ;;  %v227_v10 = vadd.s32 48, %v1537_v1  ;;  %v228_v11 = vadd.s32 56, %v1537_v1 }
  0x4c   : > { %589 = vst.msk [vmem:[%s1544_s30 + $0x50] sm:$0xff] %vm578_vm0, %v1398_v3  ;;  %590 = vst.msk [vmem:[%s1544_s30 + $0x58] sm:$0xff] %vm578_vm0, %v1398_v3  ;;  %vm249_vm1 = vcmp.lt.s32.totalorder %v236_v4, 200  ;;  %v238_v12 = vadd.s32 %v1541_v2, %v223_v5  ;;  %v237_v13 = vadd.s32 %v1541_v2, %v222_v6  ;;  %v239_v14 = vadd.s32 %v1541_v2, %v224_v7  ;;  %v214_v48 = vld [vmem:[%s1530_s18 + $0x38] sm:$0xff]  ;;  %s645_s19 = ssub.s32 (%p1464_p9), 25, %s644_s8 }
  0x4d   : > { %591 = vst.msk [vmem:[%s1544_s30 + $0x60] sm:$0xff] %vm578_vm0, %v1398_v3  ;;  %v240_v18 = vadd.s32 %v1541_v2, %v225_v8  ;;  %v241_v19 = vadd.s32 %v1541_v2, %v226_v9  ;;  %v242_v20 = vadd.s32 %v1541_v2, %v227_v10  ;;  %v243_v21 = vadd.s32 %v1541_v2, %v228_v11  ;;  %p646_p8 = scmp.lt.s32.totalorder (%p1464_p9), %s645_s19, 13 }
  0x4e   : > { %v1591_v22 = vsel %vm249_vm1, %v207_v15, 0.0  ;;  %vm251_vm2 = vcmp.lt.s32.totalorder %v238_v12, 200  ;;  %vm250_vm3 = vcmp.lt.s32.totalorder %v237_v13, 200  ;;  %vm252_vm4 = vcmp.lt.s32.totalorder %v239_v14, 200 }
  0x4f   : > { %v340_v24 = vand.u32 2147483647, %v1591_v22  ;;  %v275_v25 = vmul.f32 0.5, %v1591_v22  ;;  %v1596_v26 = vsel %vm251_vm2, %v209_v16, 0.0  ;;  %v1598_v27 = vsel %vm250_vm3, %v208_v17, 0.0 }
  0x50   : > { %v342_v29 = vand.u32 2147483647, %v1596_v26  ;;  %v277_v30 = vmul.f32 0.5, %v1596_v26  ;;  %v276_v31 = vmul.f32 0.5, %v1598_v27  ;;  %v341_v32 = vand.u32 2147483647, %v1598_v27 }
  0x51   : > { %v353_v33 = vsub.f32 0.0, %v340_v24  ;;  %1137 = vtanh.f32 %v275_v25  ;;  %v1607_v34 = vsel %vm252_vm4, %v210_v23, 0.0  ;;  %vm253_vm5 = vcmp.lt.s32.totalorder %v240_v18, 200 }
  0x52   : > { %v355_v35 = vsub.f32 0.0, %v342_v29  ;;  %1139 = vtanh.f32 %v277_v30  ;;  %v354_v36 = vsub.f32 0.0, %v341_v32  ;;  %v278_v37 = vmul.f32 0.5, %v1607_v34 }
  0x53   : > { %v366_v38 = vmul.f32 1.442695, %v353_v33  ;;  %1141 = vtanh.f32 %v276_v31  ;;  %v343_v39 = vand.u32 2147483647, %v1607_v34  ;;  %v1615_v40 = vsel %vm253_vm5, %v211_v28, 0.0 }
  0x54   : > { %v370_v42 = vmul.f32 1.442695, %v355_v35  ;;  %v368_v43 = vmul.f32 1.442695, %v354_v36  ;;  %1143 = vtanh.f32 %v278_v37  ;;  %v279_v44 = vmul.f32 0.5, %v1615_v40 }
  0x55   : > { %1145 = vpow2.f32 %v366_v38  ;;  %v356_v45 = vsub.f32 0.0, %v343_v39  ;;  %v344_v46 = vand.u32 2147483647, %v1615_v40  ;;  %vm254_vm6 = vcmp.lt.s32.totalorder %v241_v19, 200 }
  0x56   : > { %1147 = vpow2.f32 %v370_v42  ;;  %v1624_v49 = vsel %vm254_vm6, %v212_v41, 0.0  ;;  %vm255_vm7 = vcmp.lt.s32.totalorder %v242_v20, 200  ;;  %vm256_vm8 = vcmp.lt.s32.totalorder %v243_v21, 200 }
  0x57   : > { %1149 = vpow2.f32 %v368_v43  ;;  %v372_v50 = vmul.f32 1.442695, %v356_v45  ;;  %v357_v51 = vsub.f32 0.0, %v344_v46  ;;  %v280_v52 = vmul.f32 0.5, %v1624_v49 }
  0x58   : > { %1151 = vtanh.f32 %v279_v44  ;;  %v345_v53 = vand.u32 2147483647, %v1624_v49  ;;  %v1630_v54 = vsel %vm255_vm7, %v213_v47, 0.0  ;;  %v1632_v55 = vsel %vm256_vm8, %v214_v48, 0.0  ;;  %v218_v49 = vld [vmem:[%s1530_s18 + $0x58] sm:$0xff] }
  0x59   : > { %1153 = vpow2.f32 %v372_v50  ;;  %v374_v56 = vmul.f32 1.442695, %v357_v51  ;;  %v281_v57 = vmul.f32 0.5, %v1630_v54  ;;  %v346_v58 = vand.u32 2147483647, %v1630_v54 }
  0x5a   : > { %1155 = vtanh.f32 %v280_v52  ;;  %v358_v59 = vsub.f32 0.0, %v345_v53  ;;  %v282_v60 = vmul.f32 0.5, %v1632_v55  ;;  %v347_v61 = vand.u32 2147483647, %v1632_v55 }
  0x5b   : > { %v1138_v62 = vpop.eup %1137  ;;  %1157 = vpow2.f32 %v374_v56  ;;  %v359_v63 = vsub.f32 0.0, %v346_v58  ;;  %v229_v0 = vadd.s32 64, %v1537_v1  ;;  %v1655_v37 = vadd.s32 72, %v1537_v1 }
  0x5c   : > { %v1140_v3 = vpop.eup %1139  ;;  %v301_v4 = vadd.f32 1.0, %v1138_v62  ;;  %v376_v5 = vmul.f32 1.442695, %v358_v59  ;;  %1159 = vtanh.f32 %v281_v57  ;;  %v360_v12 = vsub.f32 0.0, %v347_v61 }
  0x5d   : > { %v1142_v6 = vpop.eup %1141  ;;  %v303_v7 = vadd.f32 1.0, %v1140_v3  ;;  %v378_v8 = vmul.f32 1.442695, %v359_v63  ;;  %1161 = vtanh.f32 %v282_v60  ;;  %v1646_v16 = vadd.s32 %v1541_v2, %v229_v0 }
  0x5e   : > { %v1144_v9 = vpop.eup %1143  ;;  %v314_v10 = vmul.f32 0.5, %v301_v4  ;;  %v302_v11 = vadd.f32 1.0, %v1142_v6  ;;  %1163 = vpow2.f32 %v376_v5  ;;  %v380_v43 = vmul.f32 1.442695, %v360_v12 }
  0x5f   : > { %v1146_v13 = vpop.eup %1145  ;;  %v316_v14 = vmul.f32 0.5, %v303_v7  ;;  %v304_v15 = vadd.f32 1.0, %v1144_v9  ;;  %1165 = vpow2.f32 %v378_v8  ;;  %vm257_vm10 = vcmp.lt.s32.totalorder %v1646_v16, 200 }
  0x60   : > { %v1148_v17 = vpop.eup %1147  ;;  %v392_v18 = vadd.f32 1.0, %v1146_v13  ;;  %v395_v19 = vmul.f32 -0.5, %v1146_v13  ;;  %v398_v20 = vand.u32 2147483647, %v1146_v13  ;;  %327 = vst [vmem:[%s1649_s20] sm:$0xff] %v314_v10  ;;  %v315_v21 = vmul.f32 0.5, %v302_v11 }
  0x61   : > { %v1150_v23 = vpop.eup %1149  ;;  %v410_v25 = vadd.f32 1.0, %v1148_v17  ;;  %v413_v28 = vmul.f32 -0.5, %v1148_v17  ;;  %v416_v30 = vand.u32 2147483647, %v1148_v17  ;;  %329 = vst [vmem:[%s1649_s20 + $0x10] sm:$0xff] %v316_v14  ;;  %v317_v31 = vmul.f32 0.5, %v304_v15 }
  0x62   : > { %v1152_v33 = vpop.eup %1151  ;;  %1167 = vlog2.f32 %v392_v18  ;;  %v396_v35 = vadd.f32 1.0, %v395_v19  ;;  %328 = vst [vmem:[%s1649_s20 + $0x8] sm:$0xff] %v315_v21  ;;  %v401_v36 = vadd.f32 1.0, %v1150_v23  ;;  %v404_v42 = vmul.f32 -0.5, %v1150_v23 }
  0x63   : > { %v1154_v38 = vpop.eup %1153  ;;  %1169 = vlog2.f32 %v410_v25  ;;  %v414_v41 = vadd.f32 1.0, %v413_v28  ;;  %330 = vst [vmem:[%s1649_s20 + $0x18] sm:$0xff] %v317_v31  ;;  %vm1658_vm9 = vcmp.lt.f32.partialorder %v398_v20, 0.0004427343  ;;  %v407_v47 = vand.u32 2147483647, %v1150_v23 }
  0x64   : > { %v1156_v44 = vpop.eup %1155  ;;  %1171 = vlog2.f32 %v401_v36  ;;  %v419_v48 = vadd.f32 1.0, %v1154_v38  ;;  %v397_v51 = vmul.f32 %v1146_v13, %v396_v35  ;;  %vm1663_vm11 = vcmp.lt.f32.partialorder %v416_v30, 0.0004427343 }
  0x65   : > { %v1158_v50 = vpop.eup %1157  ;;  %v405_v56 = vadd.f32 1.0, %v404_v42  ;;  %v422_v57 = vmul.f32 -0.5, %v1154_v38  ;;  %v425_v59 = vand.u32 2147483647, %v1154_v38  ;;  %v415_v62 = vmul.f32 %v1148_v17, %v414_v41  ;;  %v215_v41 = vld [vmem:[%s1530_s18 + $0x40] sm:$0xff] }
  0x66   : > { %v1160_v60 = vpop.eup %1159  ;;  %1173 = vlog2.f32 %v419_v48  ;;  %v305_v63 = vadd.f32 1.0, %v1152_v33  ;;  %v428_v0 = vadd.f32 1.0, %v1158_v50  ;;  %vm1667_vm12 = vcmp.lt.f32.partialorder %v407_v47, 0.0004427343 }
  0x67   : > { %v1162_v3 = vpop.eup %1161  ;;  %v406_v4 = vmul.f32 %v1150_v23, %v405_v56  ;;  %v423_v6 = vadd.f32 1.0, %v422_v57  ;;  %v431_v7 = vmul.f32 -0.5, %v1158_v50  ;;  %v434_v10 = vand.u32 2147483647, %v1158_v50 }
  0x68   : > { %v1164_v8 = vpop.eup %1163  ;;  %v318_v9 = vmul.f32 0.5, %v305_v63  ;;  %1175 = vlog2.f32 %v428_v0  ;;  %v306_v11 = vadd.f32 1.0, %v1156_v44  ;;  %vm1671_vm13 = vcmp.lt.f32.partialorder %v425_v59, 0.0004427343 }
  0x69   : > { %v1166_v12 = vpop.eup %1165  ;;  %v432_v14 = vadd.f32 1.0, %v431_v7  ;;  %v437_v15 = vadd.f32 1.0, %v1164_v8  ;;  %v440_v17 = vmul.f32 -0.5, %v1164_v8  ;;  %v424_v18 = vmul.f32 %v1154_v38, %v423_v6 }
  0x6a   : > { %331 = vst [vmem:[%s1649_s20 + $0x20] sm:$0xff] %v318_v9  ;;  %v319_v19 = vmul.f32 0.5, %v306_v11  ;;  %v443_v20 = vand.u32 2147483647, %v1164_v8  ;;  %v307_v21 = vadd.f32 1.0, %v1160_v60  ;;  %v446_v28 = vadd.f32 1.0, %v1166_v12 }
  0x6b   : > { %vm1676_vm14 = vcmp.lt.f32.partialorder %v434_v10, 0.0004427343  ;;  %1177 = vlog2.f32 %v437_v15  ;;  %v441_v25 = vadd.f32 1.0, %v440_v17  ;;  %v433_v31 = vmul.f32 %v1158_v50, %v432_v14  ;;  %v216_v17 = vld [vmem:[%s1530_s18 + $0x48] sm:$0xff] }
  0x6c   : > { %v1168_v30 = vpop.eup %1167  ;;  %332 = vst [vmem:[%s1649_s20 + $0x28] sm:$0xff] %v319_v19  ;;  %v320_v33 = vmul.f32 0.5, %v307_v21  ;;  %v449_v35 = vmul.f32 -0.5, %v1166_v12  ;;  %v452_v36 = vand.u32 2147483647, %v1166_v12  ;;  %1179 = vlog2.f32 %v446_v28 }
  0x6d   : > { %v1170_v38 = vpop.eup %1169  ;;  %v394_v42 = vmul.f32 0.6931472, %v1168_v30  ;;  %vm1682_vm15 = vcmp.lt.f32.partialorder %v443_v20, 0.0004427343  ;;  %v308_v47 = vadd.f32 1.0, %v1162_v3  ;;  %v442_v57 = vmul.f32 %v1164_v8, %v441_v25 }
  0x6e   : > { %v1172_v48 = vpop.eup %1171  ;;  %v412_v56 = vmul.f32 0.6931472, %v1170_v38  ;;  %333 = vst [vmem:[%s1649_s20 + $0x30] sm:$0xff] %v320_v33  ;;  %v450_v59 = vadd.f32 1.0, %v449_v35  ;;  %1181 = vpow2.f32 %v380_v43  ;;  %vm1689_vm1 = vcmp.lt.f32.partialorder %v452_v36, 0.0004427343 }
  0x6f   : > { %v400_v50 = vsel %vm1658_vm9, %v397_v51, %v394_v42  ;;  %v403_v60 = vmul.f32 0.6931472, %v1172_v48  ;;  %v321_v0 = vmul.f32 0.5, %v308_v47  ;;  %v1695_v3 = vsel %vm257_vm10, %v215_v41, 0.0 }
  0x70   : > { %v1174_v6 = vpop.eup %1173  ;;  %v509_v7 = vmul.f32 2.0, %v400_v50  ;;  %v418_v8 = vsel %vm1663_vm11, %v415_v62, %v412_v56  ;;  %v451_v43 = vmul.f32 %v1166_v12, %v450_v59  ;;  %v283_v45 = vmul.f32 0.5, %v1695_v3 }
  0x71   : > { %v511_v51 = vmul.f32 2.0, %v418_v8  ;;  %v409_v9 = vsel %vm1667_vm12, %v406_v4, %v403_v60  ;;  %v421_v10 = vmul.f32 0.6931472, %v1174_v6  ;;  %334 = vst [vmem:[%s1649_s20 + $0x38] sm:$0xff] %v321_v0  ;;  %v348_v11 = vand.u32 2147483647, %v1695_v3 }
  0x72   : > { %v1176_v16 = vpop.eup %1175  ;;  %v522_v14 = vadd.f32 %v509_v7, %v340_v24  ;;  %v510_v15 = vmul.f32 2.0, %v409_v9  ;;  %1183 = vtanh.f32 %v283_v45  ;;  %v245_v52 = vadd.s32 %v1541_v2, %v1655_v37 }
  0x73   : > { %v524_v62 = vadd.f32 %v511_v51, %v342_v29  ;;  %v427_v4 = vsel %vm1671_vm13, %v424_v18, %v421_v10  ;;  %v430_v5 = vmul.f32 0.6931472, %v1176_v16  ;;  %v361_v12 = vsub.f32 0.0, %v348_v11 }
  0x74   : > { %v535_v19 = vsub.f32 0.0, %v522_v14  ;;  %v523_v22 = vadd.f32 %v510_v15, %v341_v32  ;;  %v512_v24 = vmul.f32 2.0, %v427_v4  ;;  %vm258_vm2 = vcmp.lt.s32.totalorder %v245_v52, 200  ;;  %v219_v14 = vld [vmem:[%s1530_s18 + $0x60] sm:$0xff] }
  0x75   : > { %v1178_v20 = vpop.eup %1177  ;;  %v537_v21 = vsub.f32 0.0, %v524_v62  ;;  %v436_v37 = vsel %vm1676_vm14, %v433_v31, %v430_v5  ;;  %v382_v26 = vmul.f32 1.442695, %v361_v12  ;;  %v1719_v29 = vsel %vm258_vm2, %v216_v17, 0.0 }
  0x76   : > { %548 = vadd.xlane.f32.xlu0 %v535_v19  ;;  %v536_v13 = vsub.f32 0.0, %v523_v22  ;;  %v525_v18 = vadd.f32 %v512_v24, %v343_v39  ;;  %v513_v25 = vmul.f32 2.0, %v436_v37  ;;  %v439_v28 = vmul.f32 0.6931472, %v1178_v20  ;;  %v1180_v30 = vpop.eup %1179 }
  0x77   : > { %552 = vadd.xlane.f32.xlu1 %v537_v21  ;;  %1185 = vpow2.f32 %v382_v26  ;;  %v284_v27 = vmul.f32 0.5, %v1719_v29  ;;  %v349_v32 = vand.u32 2147483647, %v1719_v29  ;;  %v231_v23 = vadd.s32 80, %v1537_v1 }
  0x78   : > { %v1182_v31 = vpop.eup %1181  ;;  %v538_v33 = vsub.f32 0.0, %v525_v18  ;;  %v526_v35 = vadd.f32 %v513_v25, %v344_v46  ;;  %v445_v34 = vsel %vm1682_vm15, %v442_v57, %v439_v28  ;;  %v448_v39 = vmul.f32 0.6931472, %v1180_v30  ;;  %v217_v57 = vld [vmem:[%s1530_s18 + $0x50] sm:$0xff] }
  0x79   : > { %v514_v36 = vmul.f32 2.0, %v445_v34  ;;  %v455_v41 = vadd.f32 1.0, %v1182_v31  ;;  %1187 = vtanh.f32 %v284_v27  ;;  %v362_v47 = vsub.f32 0.0, %v349_v32 }
  0x7a   : > { %550 = vadd.xlane.f32.xlu0 %v536_v13  ;;  %v539_v38 = vsub.f32 0.0, %v526_v35  ;;  %v454_v42 = vsel %vm1689_vm1, %v451_v43, %v448_v39  ;;  %v458_v44 = vmul.f32 -0.5, %v1182_v31  ;;  %v246_v59 = vadd.s32 %v1541_v2, %v231_v23 }
  0x7b   : > { %554 = vadd.xlane.f32.xlu1 %v538_v33  ;;  %v527_v40 = vadd.f32 %v514_v36, %v345_v53  ;;  %v515_v46 = vmul.f32 2.0, %v454_v42  ;;  %1189 = vlog2.f32 %v455_v41  ;;  %v384_v56 = vmul.f32 1.442695, %v362_v47 }
  0x7c   : > { %v1184_v48 = vpop.eup %1183  ;;  %v232_v50 = vadd.s32 88, %v1537_v1  ;;  %v461_v0 = vand.u32 2147483647, %v1182_v31  ;;  %vm259_vm3 = vcmp.lt.s32.totalorder %v246_v59, 200  ;;  %v233_v7 = vadd.s32 96, %v1537_v1 }
  0x7d   : > { %v540_v60 = vsub.f32 0.0, %v527_v40  ;;  %v528_v63 = vadd.f32 %v515_v46, %v346_v58  ;;  %v309_v6 = vadd.f32 1.0, %v1184_v48  ;;  %1191 = vpow2.f32 %v384_v56 }
  0x7e   : > { %556 = vadd.xlane.f32.xlu0 %v539_v38  ;;  %v247_v53 = vadd.s32 %v1541_v2, %v232_v50  ;;  %v459_v43 = vadd.f32 1.0, %v458_v44  ;;  %v1744_v51 = vsel %vm259_vm3, %v217_v57, 0.0  ;;  %v248_v9 = vadd.s32 %v1541_v2, %v233_v7 }
  0x7f   : > { %558 = vadd.xlane.f32.xlu1 %v540_v60  ;;  %v541_v8 = vsub.f32 0.0, %v528_v63  ;;  %v322_v45 = vmul.f32 0.5, %v309_v6  ;;  %v285_v54 = vmul.f32 0.5, %v1744_v51  ;;  %v350_v58 = vand.u32 2147483647, %v1744_v51 }
  0x80   : > { %vm260_vm4 = vcmp.lt.s32.totalorder %v247_v53, 200  ;;  %vm1753_vm5 = vcmp.lt.f32.partialorder %v461_v0, 0.0004427343  ;;  %vm261_vm6 = vcmp.lt.s32.totalorder %v248_v9, 200  ;;  %v460_v4 = vmul.f32 %v1182_v31, %v459_v43 }
  0x81   : > { %v1186_v10 = vpop.eup %1185  ;;  %335 = vst [vmem:[%s1649_s20 + $0x40] sm:$0xff] %v322_v45  ;;  %v1750_v16 = vsel %vm260_vm4, %v218_v49, 0.0  ;;  %1193 = vtanh.f32 %v285_v54  ;;  %v363_v17 = vsub.f32 0.0, %v350_v58  ;;  %v1761_v12 = vsel %vm261_vm6, %v219_v14, 0.0 }
  0x82   : > { %560 = vadd.xlane.f32.xlu0 %v541_v8  ;;  %v464_v15 = vadd.f32 1.0, %v1186_v10  ;;  %v286_v52 = vmul.f32 0.5, %v1750_v16  ;;  %v351_v62 = vand.u32 2147483647, %v1750_v16  ;;  %v467_v5 = vmul.f32 -0.5, %v1186_v10 }
  0x83   : > { %v1188_v2 = vpop.eup %1187  ;;  %v386_v24 = vmul.f32 1.442695, %v363_v17  ;;  %v287_v37 = vmul.f32 0.5, %v1761_v12  ;;  %v352_v26 = vand.u32 2147483647, %v1761_v12  ;;  %v595_v12 = vld [vmem:[%s1544_s30 + $0x18] sm:$0xff] }
  0x84   : > { %1195 = vlog2.f32 %v464_v15  ;;  %v310_v22 = vadd.f32 1.0, %v1188_v2  ;;  %v364_v20 = vsub.f32 0.0, %v351_v62  ;;  %v468_v23 = vadd.f32 1.0, %v467_v5 }
  0x85   : > { %v1190_v19 = vpop.eup %1189  ;;  %1197 = vtanh.f32 %v286_v52  ;;  %v365_v30 = vsub.f32 0.0, %v352_v26  ;;  %v470_v33 = vand.u32 2147483647, %v1186_v10 }
  0x86   : > { %v457_v21 = vmul.f32 0.6931472, %v1190_v19  ;;  %v323_v13 = vmul.f32 0.5, %v310_v22  ;;  %1199 = vpow2.f32 %v386_v24  ;;  %v388_v18 = vmul.f32 1.442695, %v364_v20 }
  0x87   : > { %v1192_v25 = vpop.eup %1191  ;;  %1201 = vtanh.f32 %v287_v37  ;;  %v390_v35 = vmul.f32 1.442695, %v365_v30  ;;  %v469_v38 = vmul.f32 %v1186_v10, %v468_v23  ;;  %vm471_vm7 = vcmp.lt.f32.partialorder %v470_v33, 0.0004427343 }
  0x88   : > { %v463_v28 = vsel %vm1753_vm5, %v460_v4, %v457_v21  ;;  %336 = vst [vmem:[%s1649_s20 + $0x48] sm:$0xff] %v323_v13  ;;  %v473_v31 = vadd.f32 1.0, %v1192_v25  ;;  %1203 = vpow2.f32 %v388_v18  ;;  %v476_v36 = vmul.f32 -0.5, %v1192_v25 }
  0x89   : > { %v516_v27 = vmul.f32 2.0, %v463_v28 }
  0x8a   : > { %1205 = vlog2.f32 %v473_v31  ;;  %v477_v48 = vadd.f32 1.0, %v476_v36 }
  0x8b   : > { %v529_v34 = vadd.f32 %v516_v27, %v347_v61  ;;  %v1194_v39 = vpop.eup %1193  ;;  %1207 = vpow2.f32 %v390_v35  ;;  %v479_v61 = vand.u32 2147483647, %v1192_v25 }
  0x8c   : > { %v311_v42 = vadd.f32 1.0, %v1194_v39  ;;  %v478_v53 = vmul.f32 %v1192_v25, %v477_v48 }
  0x8d   : > { %v542_v41 = vsub.f32 0.0, %v529_v34  ;;  %vm480_vm8 = vcmp.lt.f32.partialorder %v479_v61, 0.0004427343 }
  0x8e   : > { %v1196_v47 = vpop.eup %1195  ;;  %v324_v44 = vmul.f32 0.5, %v311_v42  ;;  %v594_v42 = vld [vmem:[%s1544_s30 + $0x10] sm:$0xff] }
  0x8f   : > { %v1198_v40 = vpop.eup %1197  ;;  %562 = vadd.xlane.f32.xlu1 %v542_v41  ;;  %v466_v46 = vmul.f32 0.6931472, %v1196_v47 }
  0x90   : > { %v312_v56 = vadd.f32 1.0, %v1198_v40  ;;  %v1200_v57 = vpop.eup %1199  ;;  %337 = vst [vmem:[%s1649_s20 + $0x50] sm:$0xff] %v324_v44 }
  0x91   : > { %v472_v55 = vsel %vm471_vm7, %v469_v38, %v466_v46  ;;  %v1202_v59 = vpop.eup %1201  ;;  %v482_v60 = vadd.f32 1.0, %v1200_v57  ;;  %v485_v8 = vmul.f32 -0.5, %v1200_v57  ;;  %v592_v38 = vld [vmem:[%s1544_s30] sm:$0xff]  ;;  %v593_v46 = vld [vmem:[%s1544_s30 + $0x8] sm:$0xff] }
  0x92   : > { %v517_v50 = vmul.f32 2.0, %v472_v55  ;;  %v325_v63 = vmul.f32 0.5, %v312_v56  ;;  %v313_v0 = vadd.f32 1.0, %v1202_v59  ;;  %v1204_v6 = vpop.eup %1203  ;;  %v597_v55 = vld [vmem:[%s1544_s30 + $0x28] sm:$0xff] }
  0x93   : > { %1209 = vlog2.f32 %v482_v60  ;;  %v491_v43 = vadd.f32 1.0, %v1204_v6  ;;  %v494_v15 = vmul.f32 -0.5, %v1204_v6  ;;  %v486_v3 = vadd.f32 1.0, %v485_v8  ;;  %v600_v8 = vld [vmem:[%s1544_s30 + $0x40] sm:$0xff] }
  0x94   : > { %v530_v49 = vadd.f32 %v517_v50, %v348_v11  ;;  %v1206_v7 = vpop.eup %1205  ;;  %338 = vst [vmem:[%s1649_s20 + $0x58] sm:$0xff] %v325_v63  ;;  %v326_v45 = vmul.f32 0.5, %v313_v0  ;;  %v488_v11 = vand.u32 2147483647, %v1200_v57  ;;  %v497_v22 = vand.u32 2147483647, %v1204_v6 }
  0x95   : > { %v1208_v54 = vpop.eup %1207  ;;  %v475_v10 = vmul.f32 0.6931472, %v1206_v7  ;;  %1211 = vlog2.f32 %v491_v43  ;;  %v495_v4 = vadd.f32 1.0, %v494_v15  ;;  %v487_v19 = vmul.f32 %v1200_v57, %v486_v3  ;;  %v596_v57 = vld [vmem:[%s1544_s30 + $0x20] sm:$0xff]  ;;  %v598_v63 = vld [vmem:[%s1544_s30 + $0x30] sm:$0xff] }
  0x96   : > { %v543_v9 = vsub.f32 0.0, %v530_v49  ;;  %339 = vst [vmem:[%s1649_s20 + $0x60] sm:$0xff] %v326_v45  ;;  %v500_v14 = vadd.f32 1.0, %v1208_v54  ;;  %v503_v52 = vmul.f32 -0.5, %v1208_v54  ;;  %vm489_vm9 = vcmp.lt.f32.partialorder %v488_v11, 0.0004427343 }
  0x97   : > { %v481_v1 = vsel %vm480_vm8, %v478_v53, %v475_v10  ;;  %v506_v37 = vand.u32 2147483647, %v1208_v54  ;;  %v496_v13 = vmul.f32 %v1204_v6, %v495_v4  ;;  %vm498_vm10 = vcmp.lt.f32.partialorder %v497_v22, 0.0004427343  ;;  %v599_v49 = vld [vmem:[%s1544_s30 + $0x38] sm:$0xff]  ;;  %v604_v11 = vld [vmem:[%s1544_s30 + $0x60] sm:$0xff] }
  0x98   : > { %564 = vadd.xlane.f32.xlu0 %v543_v9  ;;  %v518_v17 = vmul.f32 2.0, %v481_v1  ;;  %1213 = vlog2.f32 %v500_v14  ;;  %v504_v20 = vadd.f32 1.0, %v503_v52  ;;  %v602_v14 = vld [vmem:[%s1544_s30 + $0x50] sm:$0xff] }
  0x99   : > { %vm507_vm11 = vcmp.lt.f32.partialorder %v506_v37, 0.0004427343 }
  0x9a   : > { %v531_v2 = vadd.f32 %v518_v17, %v349_v32  ;;  %v505_v27 = vmul.f32 %v1208_v54, %v504_v20  ;;  %v601_v54 = vld [vmem:[%s1544_s30 + $0x48] sm:$0xff]  ;;  %v603_v17 = vld [vmem:[%s1544_s30 + $0x58] sm:$0xff] }
  0x9c   : > { %v544_v5 = vsub.f32 0.0, %v531_v2 }
  0x9d   : > { %v1210_v24 = vpop.eup %1209 }
  0x9e   : > { %566 = vadd.xlane.f32.xlu1 %v544_v5  ;;  %v484_v21 = vmul.f32 0.6931472, %v1210_v24 }
  0x9f   : > { %v1212_v18 = vpop.eup %1211 }
  0xa0   : > { %v490_v25 = vsel %vm489_vm9, %v487_v19, %v484_v21  ;;  %v493_v30 = vmul.f32 0.6931472, %v1212_v18 }
  0xa1   : > { %v519_v28 = vmul.f32 2.0, %v490_v25 }
  0xa2   : > { %v1214_v23 = vpop.eup %1213  ;;  %v499_v32 = vsel %vm498_vm10, %v496_v13, %v493_v30 }
  0xa3   : > { %v532_v29 = vadd.f32 %v519_v28, %v350_v58  ;;  %v502_v31 = vmul.f32 0.6931472, %v1214_v23  ;;  %v520_v33 = vmul.f32 2.0, %v499_v32 }
  0xa5   : > { %v545_v35 = vsub.f32 0.0, %v532_v29  ;;  %v508_v34 = vsel %vm507_vm11, %v505_v27, %v502_v31  ;;  %v533_v39 = vadd.f32 %v520_v33, %v351_v62 }
  0xa6   : > { %v521_v36 = vmul.f32 2.0, %v508_v34 }
  0xa7   : > { %568 = vadd.xlane.f32.xlu0 %v545_v35  ;;  %v546_v41 = vsub.f32 0.0, %v533_v39 }
  0xa8   : > { %v534_v51 = vadd.f32 %v521_v36, %v352_v26 }
  0xa9   : > { %570 = vadd.xlane.f32.xlu1 %v546_v41 }
  0xaa   : > { %v547_v58 = vsub.f32 0.0, %v534_v51 }
  0xac   : > { %572 = vadd.xlane.f32.xlu0 %v547_v58 }
 0x103   : > { %v549_v16 = vpop.xlane.xlu0 %548 }
 0x104   : > { %v605_v47 = vadd.f32 %v592_v38, %v549_v16  ;;  %v553_v62 = vpop.xlane.xlu1 %552 }
 0x105   : > { %v607_v40 = vadd.f32 %v594_v42, %v553_v62 }
 0x106   : > { %619 = vst.msk [vmem:[%s1544_s30] sm:$0xff] %vm578_vm0, %v605_v47 }
 0x107   : > { %621 = vst.msk [vmem:[%s1544_s30 + $0x10] sm:$0xff] %vm578_vm0, %v607_v40  ;;  %v551_v26 = vpop.xlane.xlu0 %550 }
 0x108   : > { %v606_v44 = vadd.f32 %v593_v46, %v551_v26  ;;  %v555_v48 = vpop.xlane.xlu1 %554 }
 0x109   : > { %v608_v56 = vadd.f32 %v595_v12, %v555_v48 }
 0x10a   : > { %620 = vst.msk [vmem:[%s1544_s30 + $0x8] sm:$0xff] %vm578_vm0, %v606_v44 }
 0x10b   : > { %622 = vst.msk [vmem:[%s1544_s30 + $0x18] sm:$0xff] %vm578_vm0, %v608_v56  ;;  %v557_v61 = vpop.xlane.xlu0 %556 }
 0x10c   : > { %v609_v59 = vadd.f32 %v596_v57, %v557_v61  ;;  %v559_v50 = vpop.xlane.xlu1 %558 }
 0x10d   : > { %v610_v60 = vadd.f32 %v597_v55, %v559_v50 }
 0x10e   : > { %623 = vst.msk [vmem:[%s1544_s30 + $0x20] sm:$0xff] %vm578_vm0, %v609_v59 }
 0x10f   : > { %624 = vst.msk [vmem:[%s1544_s30 + $0x28] sm:$0xff] %vm578_vm0, %v610_v60  ;;  %v561_v0 = vpop.xlane.xlu0 %560 }
 0x110   : > { %v611_v6 = vadd.f32 %v598_v63, %v561_v0 }
 0x112   : > { %625 = vst.msk [vmem:[%s1544_s30 + $0x30] sm:$0xff] %vm578_vm0, %v611_v6 }
 0x11c   : > { %v563_v53 = vpop.xlane.xlu1 %562 }
 0x11d   : > { %v612_v7 = vadd.f32 %v599_v49, %v563_v53 }
 0x11f   : > { %626 = vst.msk [vmem:[%s1544_s30 + $0x38] sm:$0xff] %vm578_vm0, %v612_v7 }
 0x125   : > { %v565_v43 = vpop.xlane.xlu0 %564 }
 0x126   : > { %v613_v45 = vadd.f32 %v600_v8, %v565_v43 }
 0x128   : > { %627 = vst.msk [vmem:[%s1544_s30 + $0x40] sm:$0xff] %vm578_vm0, %v613_v45 }
 0x12b   : > { %v567_v9 = vpop.xlane.xlu1 %566 }
 0x12c   : > { %v614_v10 = vadd.f32 %v601_v54, %v567_v9 }
 0x12e   : > { %628 = vst.msk [vmem:[%s1544_s30 + $0x48] sm:$0xff] %vm578_vm0, %v614_v10 }
 0x134   : > { %v569_v1 = vpop.xlane.xlu0 %568 }
 0x135   : > { %v615_v15 = vadd.f32 %v602_v14, %v569_v1 }
 0x136   : > { %v571_v3 = vpop.xlane.xlu1 %570  ;;  %643 = sbr.rel (!%p1464_p9) target bundleno = 345 (0x159), region = 36 }
 0x137   : > { %629 = vst.msk [vmem:[%s1544_s30 + $0x50] sm:$0xff] %vm578_vm0, %v615_v15  ;;  %v616_v52 = vadd.f32 %v603_v17, %v571_v3 }
 0x139   : > { %v573_v2 = vpop.xlane.xlu0 %572  ;;  %630 = vst.msk [vmem:[%s1544_s30 + $0x58] sm:$0xff] %vm578_vm0, %v616_v52 }
 0x13a   : > { %v617_v4 = vadd.f32 %v604_v11, %v573_v2 }
 0x13c   : > { %631 = vst.msk [vmem:[%s1544_s30 + $0x60] sm:$0xff] %vm578_vm0, %v617_v4 }
 0x13d   : > { %s2012_s19 = smov (!%p646_p8, %s645_s19), 13 }
 0x13e   : > { %s1830_s24 = sshll.u32 %s2012_s19, 7 }
 0x13f   : > { %s650_s25 = ssub.s32 1664, %s1830_s24 }
 0x140   : > { %651 = vsyncadd %s633_s5, %s650_s25  ;;  %p991_p11 = scmp.ne.s32.totalorder %s1830_s24, 0  ;;  %s1008_s26 = smul.u32 1664, %s1353_s12 }
 0x141   : > { %s657_s27 = sshll.u32 %s1649_s20, 4  ;;  %s1399_s15 = smov [#allocation5]   ;;  %s1843_s27 = int_to_ptr.vmem [resolvable:$true] %s657_s27 }
 0x142   : > { %s1841_s4 = scalar_lea.hbm %s1975_s1, %s1008_s26  ;;  %s1247_s6 = scalar_lea.vmem %s1843_s27, %s1830_s24 }
 0x143   : > { %p1248_p12 = scmp.ne.s32.totalorder %s1843_s27, %s1247_s6  ;;  %s1251_s16 = sshll.u32 %s1399_s15, 4  ;;  %s1252_s16 = int_to_ptr.vmem [resolvable:$false] %s1251_s16 }
 0x144   : > { %s1253_s18 = scalar_lea.vmem %s1252_s16, 3328  ;;  %p1254_p1 = scmp.lt.s32.totalorder %s1843_s27, %s1252_s16 }
 0x145   : > { %p1249_p0 = pnand %p1248_p12, %p991_p11  ;;  %p1255_p2 = scmp.lt.s32.totalorder %s1253_s18, %s1247_s6 }
 0x147   : > { %p1250_p13 = pneg %p1249_p0  ;;  %p1256_p4 = por %p1255_p2, %p1254_p1 }
 0x149   : > { %p1257_p5 = pnand %p1256_p4, %p1250_p13 }
 0x14b   : > { %1260 = shalt.err (!%p1257_p5)
}
 0x14c   : > { %s1261_s20 = scalar_lea.hbm %s1841_s4, %s1830_s24  ;;  %s1265_s25 = scalar_lea.hbm %s1975_s1, 3200 }
 0x14d   : > { %p1262_p6 = scmp.ne.s32.totalorder %s1841_s4, %s1261_s20  ;;  %p1266_p10 = scmp.lt.u32.totalorder %s1841_s4, %s1975_s1 }
 0x14e   : > { %p1267_p8 = scmp.lt.u32.totalorder %s1265_s25, %s1261_s20  ;;  %p1269_p0 = scmp.lt.u32.totalorder %s1261_s20, %s1841_s4 }
 0x14f   : > { %p1263_p3 = pnand %p1262_p6, %p991_p11 }
 0x150   : > { %p1268_p12 = por %p1267_p8, %p1266_p10 }
 0x151   : > { %p1264_p7 = pneg %p1263_p3 }
 0x152   : > { %p1270_p13 = por %p1269_p0, %p1268_p12 }
 0x154   : > { %p1271_p1 = pnand %p1270_p13, %p1264_p7 }
 0x156   : > { %1274 = shalt.err (!%p1271_p1)
}
 0x157   : > { %s1400_s3 = smov 128   ;;  %s1401_s6 = smov 8  }
 0x158   : > { %663 = dma.vmem_to_hbm [thread:$0]  (%p991_p11), %s1843_s27, %s1830_s24, %s1841_s4, %s633_s5, %s1400_s3, %s1400_s3, %s1401_s6  }
 0x159 PF: > { %666 = sbr.rel (!%p1464_p9) target bundleno = 413 (0x19d), region = 40  ;;  %s1879_s20 = scalar_lea.vmem (%p1464_p9), %s1976_s2, %s234_s28  }
 0x15a   : > { %s667_s15 = smul.u32 (%p1464_p9), 13, %s1353_s12 }
 0x15c   : > { %s668_s8 = ssub.s32 (%p1464_p9), 25, %s667_s15 }
 0x15d   : > { %p669_p2 = scmp.lt.s32.totalorder (%p1464_p9), %s668_s8, 13 }
 0x160   : > { %s2014_s8 = smov (!%p669_p2, %s668_s8), 13 }
 0x161   : > { %s995_s7 = sshll.u32 %s2014_s8, 7 }
 0x162   : > { %p998_p11 = scmp.eq.s32.totalorder %s995_s7, 0 }
 0x163   : > { %1215 = sdivrem.u32 (!%p998_p11), %s2014_s8, 13 }
 0x164   : > { %677 = sbr.rel (%p998_p11) target bundleno = 413 (0x19d), region = 44 }
 0x16c   : > { %s1885_s21 = spop.drf %1215 }
 0x16d   : > { %p999_p9 = scmp.le.s32.totalorder %s1885_s21, 0 }
 0x16e   : > { %s1997_s12 = smov (!%p999_p9), %s1879_s20  ;;  %s1998_s28 = smov (!%p999_p9), %s1544_s30 }
 0x16f   : > { %916 = sbr.rel (%p999_p9) target bundleno = 384 (0x180), region = 139  ;;  %s1894_s5 = smov (!%p999_p9), 0  }
 0x170   : > { %s1896_s24 = smov (!%p999_p9), 0  }
 0x176 LB: >> { %v765_v5 = vld [vmem:[%s1369_s28] sm:$0xff]  ;;  %v767_v19 = vld [vmem:[%s1369_s28 + $0x8] sm:$0xff]  ;;  %v769_v22 = vld [vmem:[%s1369_s28 + $0x10] sm:$0xff]  ;;  %s791_s27 = sadd.s32 1, %s1373_s5  ;;  %s759_s24 = sadd.s32 1, %s1377_s24   ;;  %s1377_s24 = sphi %s1896_s24, %s759_s24   ;;  %s1373_s5 = sphi %s1894_s5, %s1999_s5   ;;  %s1369_s28 = sphi %s1998_s28, %s796_s28   ;;  %s1365_s12 = sphi %s1997_s12, %s797_s12  }
 0x177   : >> { %766 = vst [vmem:[%s1365_s12] sm:$0xff] %v765_v5  ;;  %768 = vst [vmem:[%s1365_s12 + $0x8] sm:$0xff] %v767_v19  ;;  %v771_v24 = vld [vmem:[%s1369_s28 + $0x18] sm:$0xff]  ;;  %v773_v20 = vld [vmem:[%s1369_s28 + $0x20] sm:$0xff]  ;;  %p792_p4 = scmp.ge.s32.totalorder %s791_s27, %s1885_s21  ;;  %p758_p5 = scmp.ge.s32.totalorder %s759_s24, %s1885_s21 }
 0x178   : >> { %770 = vst [vmem:[%s1365_s12 + $0x10] sm:$0xff] %v769_v22  ;;  %v775_v21 = vld [vmem:[%s1369_s28 + $0x28] sm:$0xff]  ;;  %772 = vst [vmem:[%s1365_s12 + $0x18] sm:$0xff] %v771_v24  ;;  %v777_v37 = vld [vmem:[%s1369_s28 + $0x30] sm:$0xff] }
 0x179   : >> { %774 = vst [vmem:[%s1365_s12 + $0x20] sm:$0xff] %v773_v20  ;;  %776 = vst [vmem:[%s1365_s12 + $0x28] sm:$0xff] %v775_v21  ;;  %v779_v13 = vld [vmem:[%s1369_s28 + $0x38] sm:$0xff]  ;;  %v781_v18 = vld [vmem:[%s1369_s28 + $0x40] sm:$0xff]  ;;  %s2016_s27 = smov (%p792_p4, %s791_s27), 0  ;;  %761 = sbr.rel (!%p758_p5) target bundleno = 374 (0x176), region = 145 }
 0x17a   : >> { %778 = vst [vmem:[%s1365_s12 + $0x30] sm:$0xff] %v777_v37  ;;  %780 = vst [vmem:[%s1365_s12 + $0x38] sm:$0xff] %v779_v13  ;;  %v783_v25 = vld [vmem:[%s1369_s28 + $0x48] sm:$0xff]  ;;  %v785_v28 = vld [vmem:[%s1369_s28 + $0x50] sm:$0xff]  ;;  %s794_s4 = smul.u32 104, %s2016_s27  ;;  %s1999_s5 = smov %s2016_s27 }
 0x17b   : >> { %782 = vst [vmem:[%s1365_s12 + $0x40] sm:$0xff] %v781_v18  ;;  %v787_v30 = vld [vmem:[%s1369_s28 + $0x58] sm:$0xff]  ;;  %784 = vst [vmem:[%s1365_s12 + $0x48] sm:$0xff] %v783_v25  ;;  %v789_v27 = vld [vmem:[%s1369_s28 + $0x60] sm:$0xff] }
 0x17c   : >> { %786 = vst [vmem:[%s1365_s12 + $0x50] sm:$0xff] %v785_v28  ;;  %788 = vst [vmem:[%s1365_s12 + $0x58] sm:$0xff] %v787_v30  ;;  %s796_s28 = scalar_lea.vmem %s1544_s30, %s794_s4 [#allocation6]  }
 0x17d   : >> { %790 = vst [vmem:[%s1365_s12 + $0x60] sm:$0xff] %v789_v27  ;;  %s797_s12 = scalar_lea.vmem %s1879_s20, %s794_s4  }
 0x180 PF: > { %1217 = sdivrem.u32 %s2014_s8, 13 }
 0x181   : > { %s1000_s19 = smul.u32 104, %s1885_s21 }
 0x183   : > { %s802_s25 = scalar_lea.vmem %s1544_s30, %s1000_s19 [#allocation6]   ;;  %s804_s26 = scalar_lea.vmem %s1879_s20, %s1000_s19  }
 0x189   : > { %s1218_s29 = spop.drf %1217 }
 0x18a   : > { %p1002_p6 = scmp.le.s32.totalorder %s1218_s29, 0 }
 0x18b   : > { %s1379_s3 = smov (!%p1002_p6), %s804_s26   ;;  %s1383_s6 = smov (!%p1002_p6), %s802_s25  }
 0x18c   : > { %930 = sbr.rel (%p1002_p6) target bundleno = 413 (0x19d), region = 150  ;;  %s1387_s15 = smov (!%p1002_p6), 0  }
 0x18d   : > { %s1391_s16 = smov (!%p1002_p6), 0  }
 0x193 LB: >> { %v814_v23 = vld [vmem:[%s1385_s6] sm:$0xff]  ;;  %s816_s18 = sadd.s32 1, %s1389_s15  ;;  %s808_s16 = sadd.s32 1, %s1393_s16   ;;  %s1393_s16 = sphi %s1391_s16, %s808_s16   ;;  %s1389_s15 = sphi %s1387_s15, %s1388_s15   ;;  %s1385_s6 = sphi %s1383_s6, %s821_s6   ;;  %s1381_s3 = sphi %s1379_s3, %s822_s3  }
 0x194   : >> { %815 = vst [vmem:[%s1381_s3] sm:$0xff] %v814_v23  ;;  %p817_p3 = scmp.ge.s32.totalorder %s816_s18, %s1218_s29  ;;  %p807_p7 = scmp.ge.s32.totalorder %s808_s16, %s1218_s29 }
 0x196   : >> { %s2018_s18 = smov (%p817_p3, %s816_s18), 0  ;;  %810 = sbr.rel (!%p807_p7) target bundleno = 403 (0x193), region = 156 }
 0x197   : >> { %s1003_s30 = sshll.u32 %s2018_s18, 3  ;;  %s1388_s15 = smov %s2018_s18  }
 0x198   : >> { %s821_s6 = scalar_lea.vmem %s802_s25, %s1003_s30 [#allocation6]   ;;  %s822_s3 = scalar_lea.vmem %s804_s26, %s1003_s30  }
 0x19d PF: > { %s834_s20 = sand.u32 1, %s1341_s9   ;;  %p2000_p10 = scmp.ne.s32.totalorder %s1980_s23, 0 }
 0x19e   : > { %p2001_p8 = scmp.ge.s32.totalorder %s1361_s14, 2  ;;  %s835_s8 = scalar_lea.sflag [#allocation4], %s834_s20 }
 0x1a0   : > { %p1015_p12 = pnand %p2001_p8, %p2000_p10 }
 0x1a2   : > { %1336 = dma.done.wait (!%p1015_p12), %s835_s8, 1664  }
 0x1a3   : > { %1338 = vsyncadd (!%p1015_p12), %s835_s8, 4294965632  ;;  %s19_s14 = sadd.s32 1, %s1361_s14   ;;  %s2002_s9 = smov %s1345_s10 }
 0x1a4   : > { %p16_p0 = scmp.ge.s32.totalorder %s19_s14, 4   ;;  %s2003_s10 = smov %s1349_s11 }
 0x1a5   : > { %s2004_s11 = smov %s1469_s22  ;;  %s2005_s12 = smov %s1357_s13 }
 0x1a6   : > { %s2006_s13 = smov %s2008_s17  ;;  %18 = sbr.rel (!%p16_p0) target bundleno = 6 (0x6), region = 167 }
 0x1ad   :  { %847 = vsyncpa [#allocation3], 1 }
 0x1ae   :  { %849 = vsyncpa [#allocation3 + $0x1], 1 }
 0x1af   :  { %850 = vsyncpa [#allocation4], 1 }
 0x1b0   :  { %852 = vsyncpa [#allocation4 + $0x1], 1 }

</bundles_post_ra>
